<compile_context>
chip_gen: v7x
topology: tpu7x:2x2x1
jax: 0.10.0
libtpu: 0.0.40
codegen_flags: <defaults>
</compile_context>

<pallas_src>
import math

import jax
import jax.numpy as jnp
from jax import lax
from jax.experimental import pallas as pl
from jax.experimental.pallas import tpu as pltpu


def _gelu_exact(x):
    # Matches torch.nn.GELU() default (erf formulation). Keep in f32 on VPU.
    return 0.5 * x * (1.0 + lax.erf(x * (1.0 / math.sqrt(2.0))))


def _round_up(x, m):
    return (x + m - 1) // m * m


def mlp_kernel(x_ref, w1_ref, b1_ref, w2_ref, b2_ref, o_ref):
    # x_ref:  (bm, D_in_p)   f32 tile of flattened tokens
    # w1_ref: (D_in_p, H_p)  bf16 full fc1 weight (transposed vs. torch)
    # b1_ref: (1, H_p)       f32 fc1 bias
    # w2_ref: (H_p, D_out_p) bf16 full fc2 weight (transposed vs. torch)
    # b2_ref: (1, D_out_p)   f32 fc2 bias
    # o_ref:  (bm, D_out_p)
    x = x_ref[...].astype(jnp.bfloat16)
    # fc1: bf16 MXU matmul with f32 accumulation, bias + GELU in f32.
    h = jnp.dot(x, w1_ref[...], preferred_element_type=jnp.float32)
    h = _gelu_exact(h + b1_ref[...])
    # dropout p=0.0 is the identity -> elided.
    # fc2: bf16 MXU matmul with f32 accumulation.
    out = jnp.dot(h.astype(jnp.bfloat16), w2_ref[...],
                  preferred_element_type=jnp.float32)
    out = out + b2_ref[...]
    o_ref[...] = out.astype(o_ref.dtype)
    # TODO(synk): if VMEM gets tight on v7x (64 MiB) at very large H, chunk the
    # fc1 output along H inside the kernel (fori_loop, unroll=True) and/or
    # single-buffer the constant weight specs via pipeline_mode=pl.Buffered(1).


def mlp_forward(x, w1, b1, w2, b2, *, block_m=256):
    """x: (B, N, D_in) float32. w1: (D_in, H), w2: (H, D_out). Returns (B, N, D_out)."""
    B, N, D_in = x.shape
    H = w1.shape[1]
    D_out = w2.shape[1]
    M = B * N

    # Lane-dense feature dims (multiples of 128); zero padding is exact:
    # padded x cols / w1 rows are zero, padded w1 cols + b1 are zero so the
    # padded hidden units are gelu(0)=0 and the matching w2 rows are zero,
    # padded w2 cols + b2 are zero so the extra output cols are zero.
    D_in_p = _round_up(D_in, 128)
    H_p = _round_up(H, 128)
    D_out_p = _round_up(D_out, 128)

    # Row tile: big tiles for real shapes, clamped for tiny inputs. Always a
    # multiple of 8 (sublane). Pad M up to the tile instead of asserting.
    bm = min(block_m, _round_up(M, 8))
    M_p = _round_up(M, bm)

    x2d = jnp.pad(x.reshape(M, D_in), ((0, M_p - M), (0, D_in_p - D_in)))
    w1p = jnp.pad(w1, ((0, D_in_p - D_in), (0, H_p - H))).astype(jnp.bfloat16)
    b1p = jnp.pad(b1, (0, H_p - H)).reshape(1, H_p).astype(jnp.float32)
    w2p = jnp.pad(w2, ((0, H_p - H), (0, D_out_p - D_out))).astype(jnp.bfloat16)
    b2p = jnp.pad(b2, (0, D_out_p - D_out)).reshape(1, D_out_p).astype(jnp.float32)

    grid = (M_p // bm,)

    out2d = pl.pallas_call(
        mlp_kernel,
        out_shape=jax.ShapeDtypeStruct((M_p, D_out_p), x.dtype),
        grid_spec=pltpu.PrefetchScalarGridSpec(
            num_scalar_prefetch=0,
            grid=grid,
            in_specs=[
                pl.BlockSpec((bm, D_in_p), lambda i: (i, 0)),    # x tile (streams)
                pl.BlockSpec((D_in_p, H_p), lambda i: (0, 0)),   # full w1 (resident)
                pl.BlockSpec((1, H_p), lambda i: (0, 0)),        # b1 (resident)
                pl.BlockSpec((H_p, D_out_p), lambda i: (0, 0)),  # full w2 (resident)
                pl.BlockSpec((1, D_out_p), lambda i: (0, 0)),    # b2 (resident)
            ],
            out_specs=pl.BlockSpec((bm, D_out_p), lambda i: (i, 0)),
        ),
        compiler_params=pltpu.CompilerParams(
            dimension_semantics=("parallel",),   # shards M tiles across TCs (v7x)
            vmem_limit_bytes=64 * 1024 * 1024,
        ),
    )(x2d, w1p, b1p, w2p, b2p)

    return out2d[:M, :D_out].reshape(B, N, D_out)


def init_mlp_params(key, in_features, hidden_features, out_features, dtype=jnp.float32):
    """Deterministic synthetic init (kaiming-uniform-ish like nn.Linear)."""
    k1, k2, k3, k4 = jax.random.split(key, 4)
    bound1 = 1.0 / math.sqrt(in_features)
    bound2 = 1.0 / math.sqrt(hidden_features)
    # stored as (in, out) = torch weight transposed
    w1 = jax.random.uniform(k1, (in_features, hidden_features), dtype, -bound1, bound1)
    b1 = jax.random.uniform(k2, (hidden_features,), dtype, -bound1, bound1)
    w2 = jax.random.uniform(k3, (hidden_features, out_features), dtype, -bound2, bound2)
    b2 = jax.random.uniform(k4, (out_features,), dtype, -bound2, bound2)
    return w1, b1, w2, b2


if __name__ == "__main__":
    # Small ViT-like shapes: batch=2, seq=8, in=32, hidden=64, out=32
    B, N, D_in, H = 2, 8, 32, 64
    D_out = D_in

    key = jax.random.PRNGKey(0)
    kx, kp = jax.random.split(key)
    x = jax.random.normal(kx, (B, N, D_in), jnp.float32)
    w1, b1, w2, b2 = init_mlp_params(kp, D_in, H, D_out)

    out = mlp_forward(x, w1, b1, w2, b2, block_m=256)
    out = jax.block_until_ready(out)

    # Reference in plain JAX using the same bf16-weight / f32-accumulate math.
    xb = x.reshape(-1, D_in).astype(jnp.bfloat16)
    h_ref = jnp.dot(xb, w1.astype(jnp.bfloat16),
                    preferred_element_type=jnp.float32) + b1
    h_ref = _gelu_exact(h_ref)
    ref = (jnp.dot(h_ref.astype(jnp.bfloat16), w2.astype(jnp.bfloat16),
                   preferred_element_type=jnp.float32) + b2).reshape(B, N, D_out)

    assert out.shape == (B, N, D_out)
    assert jnp.allclose(out, ref, atol=1e-2, rtol=1e-2), "mismatch vs reference"

    print("KERNEL_OK")
</pallas_src>

<mosaic_0001>
module attributes {stable_mosaic.version = 11 : i64} {
  func.func @mlp_kernel(%arg0: i32, %arg1: memref<16x128xf32, #tpu.memory_space<vmem>>, %arg2: memref<128x128xbf16, #tpu.memory_space<vmem>>, %arg3: memref<1x128xf32, #tpu.memory_space<vmem>>, %arg4: memref<128x128xbf16, #tpu.memory_space<vmem>>, %arg5: memref<1x128xf32, #tpu.memory_space<vmem>>, %arg6: memref<16x128xf32, #tpu.memory_space<vmem>>) attributes {dimension_semantics = [#tpu.dimension_semantics<parallel>], iteration_bounds = array<i64: 1>, scalar_prefetch = 0 : i64, scratch_operands = 0 : i64, tpu.core_type = #tpu.core_type<tc>, window_params = [{transform_indices = @transform_0, window_bounds = array<i64: 16, 128>}, {pipeline_mode = #tpu.pipeline_mode<synchronous>, transform_indices = @transform_1, window_bounds = array<i64: 128, 128>}, {pipeline_mode = #tpu.pipeline_mode<synchronous>, transform_indices = @transform_2, window_bounds = array<i64: 1, 128>}, {pipeline_mode = #tpu.pipeline_mode<synchronous>, transform_indices = @transform_3, window_bounds = array<i64: 128, 128>}, {pipeline_mode = #tpu.pipeline_mode<synchronous>, transform_indices = @transform_4, window_bounds = array<i64: 1, 128>}, {transform_indices = @transform_5, window_bounds = array<i64: 16, 128>}]} {
    %c0 = arith.constant 0 : index
    %c0_0 = arith.constant 0 : index
    %0 = vector.load %arg1[%c0, %c0_0] : memref<16x128xf32, #tpu.memory_space<vmem>>, vector<16x128xf32>
    %1 = arith.truncf %0 : vector<16x128xf32> to vector<16x128xbf16>
    %c0_1 = arith.constant 0 : index
    %c0_2 = arith.constant 0 : index
    %2 = vector.load %arg2[%c0_1, %c0_2] : memref<128x128xbf16, #tpu.memory_space<vmem>>, vector<128x128xbf16>
    %cst = arith.constant dense<0.000000e+00> : vector<16x128xf32>
    %3 = tpu.matmul %1, %2, %cst {dimension_numbers = #tpu.dot_dimension_numbers<[1], [0], [0], [1], [0, 0, 1, 1], [], []>} : vector<16x128xbf16>, vector<128x128xbf16>, vector<16x128xf32> -> vector<16x128xf32>
    %c0_3 = arith.constant 0 : index
    %c0_4 = arith.constant 0 : index
    %4 = vector.load %arg3[%c0_3, %c0_4] : memref<1x128xf32, #tpu.memory_space<vmem>>, vector<1x128xf32>
    %5 = vector.broadcast %4 : vector<1x128xf32> to vector<16x128xf32>
    %6 = arith.addf %3, %5 : vector<16x128xf32>
    %cst_5 = arith.constant 5.000000e-01 : f32
    %7 = vector.broadcast %cst_5 : f32 to vector<16x128xf32>
    %8 = arith.mulf %7, %6 : vector<16x128xf32>
    %cst_6 = arith.constant 0.707106769 : f32
    %9 = vector.broadcast %cst_6 : f32 to vector<16x128xf32>
    %10 = arith.mulf %6, %9 : vector<16x128xf32>
    %11 = math.erf %10 : vector<16x128xf32>
    %cst_7 = arith.constant 1.000000e+00 : f32
    %12 = vector.broadcast %cst_7 : f32 to vector<16x128xf32>
    %13 = arith.addf %12, %11 : vector<16x128xf32>
    %14 = arith.mulf %8, %13 : vector<16x128xf32>
    %15 = arith.truncf %14 : vector<16x128xf32> to vector<16x128xbf16>
    %c0_8 = arith.constant 0 : index
    %c0_9 = arith.constant 0 : index
    %16 = vector.load %arg4[%c0_8, %c0_9] : memref<128x128xbf16, #tpu.memory_space<vmem>>, vector<128x128xbf16>
    %cst_10 = arith.constant dense<0.000000e+00> : vector<16x128xf32>
    %17 = tpu.matmul %15, %16, %cst_10 {dimension_numbers = #tpu.dot_dimension_numbers<[1], [0], [0], [1], [0, 0, 1, 1], [], []>} : vector<16x128xbf16>, vector<128x128xbf16>, vector<16x128xf32> -> vector<16x128xf32>
    %c0_11 = arith.constant 0 : index
    %c0_12 = arith.constant 0 : index
    %18 = vector.load %arg5[%c0_11, %c0_12] : memref<1x128xf32, #tpu.memory_space<vmem>>, vector<1x128xf32>
    %19 = vector.broadcast %18 : vector<1x128xf32> to vector<16x128xf32>
    %20 = arith.addf %17, %19 : vector<16x128xf32>
    %c0_13 = arith.constant 0 : index
    %c0_14 = arith.constant 0 : index
    %21 = vector.load %arg6[%c0_13, %c0_14] : memref<16x128xf32, #tpu.memory_space<vmem>>, vector<16x128xf32>
    tpu.vector_store %arg6[%c0_13, %c0_14], %20 {strides = array<i32>} : memref<16x128xf32, #tpu.memory_space<vmem>>, vector<16x128xf32>,
    return
  }
  func.func @transform_0(%arg0: i32) -> (i32, i32) {
    %c0_i32 = arith.constant 0 : i32
    %c0_i32_0 = arith.constant 0 : i32
    return %arg0, %c0_i32 : i32, i32
  }
  func.func @transform_1(%arg0: i32) -> (i32, i32) {
    %c0_i32 = arith.constant 0 : i32
    %c0_i32_0 = arith.constant 0 : i32
    %c0_i32_1 = arith.constant 0 : i32
    return %c0_i32, %c0_i32_0 : i32, i32
  }
  func.func @transform_2(%arg0: i32) -> (i32, i32) {
    %c0_i32 = arith.constant 0 : i32
    %c0_i32_0 = arith.constant 0 : i32
    %c0_i32_1 = arith.constant 0 : i32
    return %c0_i32, %c0_i32_0 : i32, i32
  }
  func.func @transform_3(%arg0: i32) -> (i32, i32) {
    %c0_i32 = arith.constant 0 : i32
    %c0_i32_0 = arith.constant 0 : i32
    %c0_i32_1 = arith.constant 0 : i32
    return %c0_i32, %c0_i32_0 : i32, i32
  }
  func.func @transform_4(%arg0: i32) -> (i32, i32) {
    %c0_i32 = arith.constant 0 : i32
    %c0_i32_0 = arith.constant 0 : i32
    %c0_i32_1 = arith.constant 0 : i32
    return %c0_i32, %c0_i32_0 : i32, i32
  }
  func.func @transform_5(%arg0: i32) -> (i32, i32) {
    %c0_i32 = arith.constant 0 : i32
    %c0_i32_0 = arith.constant 0 : i32
    return %arg0, %c0_i32 : i32, i32
  }
}

</mosaic_0001>

<bundles_post_ra>
// kernel: tpu_custom_call.1
= control target key start
LH: loop header
LB: loop body
LE: loop exit
PB: predicated region body
PF: predicated region fallthrough
CT: control target
= control target key end

     0   :  { %10 = vsyncpa [#allocation3], 0  ;;  %s713_s0 = inlined_call_operand.hbm [shape: f32[16,128], index: 0, kind: input, shape index: {}]   ;;  %s714_s1 = inlined_call_operand.hbm [shape: bf16[128,128], index: 1, kind: input, shape index: {}]   ;;  %s715_s2 = inlined_call_operand.hbm [shape: f32[1,128], index: 2, kind: input, shape index: {}]   ;;  %s716_s3 = inlined_call_operand.hbm [shape: bf16[128,128], index: 3, kind: input, shape index: {}]   ;;  %s717_s4 = inlined_call_operand.hbm [shape: f32[1,128], index: 4, kind: input, shape index: {}]   ;;  %s718_s5 = inlined_call_operand.hbm [shape: f32[16,128], index: 5, kind: output, shape index: {}]  }
   0x1   :  { %11 = vsyncpa [#allocation6], 0 }
   0x2   :  { %12 = vsyncpa [#allocation9], 0 }
   0x3   :  { %13 = vsyncpa [#allocation4], 0  ;;  %s593_s18 = smov [#allocation5]   ;;  %s453_s22 = scalar_lea.hbm %s714_s1, 1024 }
   0x4   :  { %s31_s19 = sshll.u32 %s593_s18, 4  ;;  %p454_p0 = scmp.ne.s32.totalorder %s714_s1, %s453_s22  ;;  %s32_s19 = int_to_ptr.vmem [resolvable:$true] %s31_s19 }
   0x5   :  { %p457_p1 = scmp.lt.u32.totalorder %s453_s22, %s714_s1 }
   0x7   :  { %p459_p2 = pnand %p457_p1, %p454_p0 }
   0x9   :  { %462 = shalt.err (!%p459_p2)
}
   0xa   :  { %s463_s27 = scalar_lea.vmem %s32_s19, 1024  ;;  %p468_p4 = scmp.lt.s32.totalorder %s32_s19, %s32_s19 }
   0xb   :  { %p464_p3 = scmp.ne.s32.totalorder %s32_s19, %s463_s27  ;;  %p469_p5 = scmp.lt.s32.totalorder %s463_s27, %s463_s27 }
   0xd   :  { %p470_p6 = por %p469_p5, %p468_p4 }
   0xf   :  { %p471_p7 = pnand %p470_p6, %p464_p3 }
  0x11   :  { %474 = shalt.err (!%p471_p7)
}
  0x12   :  { %s594_s28 = smov 64   ;;  %s595_s29 = smov 4  }
  0x13   :  { %37 = dma.hbm_to_vmem [thread:$0]  %s714_s1, 1024, %s32_s19, [#allocation6], %s594_s28, %s594_s28, %s595_s29  }
  0x14   :  { %s596_s7 = smov [#allocation8]   ;;  %s597_s9 = smov [#allocation2]  }
  0x15   :  { %s53_s8 = sshll.u32 %s596_s7, 4  ;;  %s19_s10 = sshll.u32 %s597_s9, 4  ;;  %s54_s8 = int_to_ptr.vmem [resolvable:$true] %s53_s8  ;;  %s20_s10 = int_to_ptr.vmem [resolvable:$true] %s19_s10 }
  0x16   :  { %s475_s13 = scalar_lea.hbm %s716_s3, 1024 }
  0x17   :  { %p476_p8 = scmp.ne.s32.totalorder %s716_s3, %s475_s13  ;;  %p479_p9 = scmp.lt.u32.totalorder %s475_s13, %s716_s3 }
  0x19   :  { %p481_p10 = pnand %p479_p9, %p476_p8 }
  0x1b   :  { %484 = shalt.err (!%p481_p10)
}
  0x1c   :  { %s485_s1 = scalar_lea.vmem %s54_s8, 1024  ;;  %p490_p12 = scmp.lt.s32.totalorder %s54_s8, %s54_s8 }
  0x1d   :  { %p486_p11 = scmp.ne.s32.totalorder %s54_s8, %s485_s1  ;;  %p491_p13 = scmp.lt.s32.totalorder %s485_s1, %s485_s1 }
  0x1f   :  { %p492_p0 = por %p491_p13, %p490_p12 }
  0x21   :  { %p493_p1 = pnand %p492_p0, %p486_p11 }
  0x23   :  { %496 = shalt.err (!%p493_p1)
}
  0x24   :  { %59 = dma.hbm_to_vmem [thread:$0]  %s716_s3, 1024, %s54_s8, [#allocation9], %s594_s28, %s594_s28, %s595_s29  }
  0x25   :  { %s497_s22 = scalar_lea.hbm %s713_s0, 256 }
  0x26   :  { %p498_p2 = scmp.ne.s32.totalorder %s713_s0, %s497_s22  ;;  %p501_p3 = scmp.lt.u32.totalorder %s497_s22, %s713_s0 }
  0x28   :  { %p503_p4 = pnand %p501_p3, %p498_p2 }
  0x2a   :  { %506 = shalt.err (!%p503_p4)
}
  0x2b   :  { %s507_s27 = scalar_lea.vmem %s20_s10, 256  ;;  %p512_p6 = scmp.lt.s32.totalorder %s20_s10, %s20_s10 }
  0x2c   :  { %p508_p5 = scmp.ne.s32.totalorder %s20_s10, %s507_s27  ;;  %p513_p7 = scmp.lt.s32.totalorder %s507_s27, %s507_s27 }
  0x2e   :  { %p514_p8 = por %p513_p7, %p512_p6 }
  0x30   :  { %p515_p9 = pnand %p514_p8, %p508_p5 }
  0x32   :  { %518 = shalt.err (!%p515_p9)
}
  0x33   :  { %s598_s3 = smov 128   ;;  %s599_s28 = smov 8  }
  0x34   :  { %25 = dma.hbm_to_vmem [thread:$0]  %s713_s0, 256, %s20_s10, [#allocation3], %s598_s3, %s598_s3, %s599_s28  }
  0x35   :  { %s600_s6 = smov [#allocation7]   ;;  %s601_s8 = smov [#allocation10]  }
  0x36   :  { %s44_s7 = sshll.u32 %s600_s6, 4  ;;  %s66_s9 = sshll.u32 %s601_s8, 4  ;;  %s45_s7 = int_to_ptr.vmem [resolvable:$true] %s44_s7  ;;  %s67_s9 = int_to_ptr.vmem [resolvable:$true] %s66_s9 }
  0x37   :  { %s519_s13 = scalar_lea.hbm %s715_s2, 16 }
  0x38   :  { %p520_p10 = scmp.ne.s32.totalorder %s715_s2, %s519_s13  ;;  %p523_p11 = scmp.lt.u32.totalorder %s519_s13, %s715_s2 }
  0x3a   :  { %p525_p12 = pnand %p523_p11, %p520_p10 }
  0x3c   :  { %528 = shalt.err (!%p525_p12)
}
  0x3d   :  { %s529_s0 = scalar_lea.vmem %s45_s7, 16  ;;  %s533_s10 = scalar_lea.vmem %s45_s7, 32 }
  0x3e   :  { %p530_p13 = scmp.ne.s32.totalorder %s45_s7, %s529_s0  ;;  %p534_p0 = scmp.lt.s32.totalorder %s45_s7, %s45_s7 }
  0x3f   :  { %p535_p1 = scmp.lt.s32.totalorder %s533_s10, %s529_s0 }
  0x41   :  { %p536_p2 = por %p535_p1, %p534_p0 }
  0x43   :  { %p537_p3 = pnand %p536_p2, %p530_p13 }
  0x45   :  { %540 = shalt.err (!%p537_p3)
}
  0x46   :  { %47 = dma.hbm_to_vmem [thread:$0]  %s715_s2, 16, %s45_s7, [#allocation6]  }
  0x47   :  { %s541_s21 = scalar_lea.hbm %s717_s4, 16 }
  0x48   :  { %p542_p4 = scmp.ne.s32.totalorder %s717_s4, %s541_s21  ;;  %p545_p5 = scmp.lt.u32.totalorder %s541_s21, %s717_s4 }
  0x4a   :  { %p547_p6 = pnand %p545_p5, %p542_p4 }
  0x4c   :  { %550 = shalt.err (!%p547_p6)
}
  0x4d   :  { %s551_s26 = scalar_lea.vmem %s67_s9, 16  ;;  %s555_s27 = scalar_lea.vmem %s67_s9, 32 }
  0x4e   :  { %p552_p7 = scmp.ne.s32.totalorder %s67_s9, %s551_s26  ;;  %p556_p8 = scmp.lt.s32.totalorder %s67_s9, %s67_s9 }
  0x4f   :  { %p557_p9 = scmp.lt.s32.totalorder %s555_s27, %s551_s26 }
  0x51   :  { %p558_p10 = por %p557_p9, %p556_p8 }
  0x53   :  { %p559_p11 = pnand %p558_p10, %p552_p7 }
  0x55   :  { %562 = shalt.err (!%p559_p11)
}
  0x56   :  { %69 = dma.hbm_to_vmem [thread:$0]  %s717_s4, 16, %s67_s9, [#allocation9]  }
  0x57   :  { %585 = dma.done.wait [#allocation3], 256  }
  0x58   :  { %586 = vsyncadd [#allocation3], 4294967040 }
  0x59   :  { %587 = dma.done.wait [#allocation6], 1040  }
  0x5a   :  { %588 = vsyncadd [#allocation6], 4294966256 }
  0x5b   :  { %589 = dma.done.wait [#allocation9], 1040  }
  0x5c   :  { %590 = vsyncadd [#allocation9], 4294966256  ;;  %v602_v0 = vmov 0.0   ;;  %vm603_vm0 = vmmov 0   ;;  %v433_v1 = vld [vmem:[#allocation5] sm:$0xff]   ;;  %v434_v2 = vld [vmem:[#allocation5 + $0x8] sm:$0xff]  }
  0x5d   :  { %381 = vmatprep.subr.bf16.mxu0 %v602_v0  ;;  %397 = vmatprep.mubr.msk.bf16.mxu0 %vm603_vm0, %v602_v0  ;;  %v435_v3 = vld [vmem:[#allocation5 + $0x10] sm:$0xff]   ;;  %v441_v4 = vld [vmem:[#allocation8] sm:$0xff]   ;;  %v436_v5 = vld [vmem:[#allocation5 + $0x18] sm:$0xff]   ;;  %s604_s4 = smov [#allocation11]  }
  0x5e   :  { %401 = vmatprep.subr.bf16.mxu1 %v602_v0  ;;  %417 = vmatprep.mubr.msk.bf16.mxu1 %vm603_vm0, %v602_v0  ;;  %v442_v6 = vld [vmem:[#allocation8 + $0x8] sm:$0xff]   ;;  %v437_v7 = vld [vmem:[#allocation5 + $0x20] sm:$0xff]   ;;  %v440_v10 = vld [vmem:[#allocation5 + $0x38] sm:$0xff]   ;;  %s331_s30 = sshll.u32 %s604_s4, 4  ;;  %s332_s30 = int_to_ptr.vmem [resolvable:$true] %s331_s30 }
  0x5f   :  { %382 = vmatpush3.bf16.msra.mxu0 %v433_v1  ;;  %402 = vmatpush3.bf16.msra.mxu1 %v441_v4  ;;  %v438_v8 = vld [vmem:[#allocation5 + $0x28] sm:$0xff]   ;;  %v439_v9 = vld [vmem:[#allocation5 + $0x30] sm:$0xff]   ;;  %v87_v12 = vld [vmem:[#allocation2 + $0x8] sm:$0xff]  ;;  %s563_s6 = scalar_lea.vmem %s332_s30, 256  ;;  %p568_p13 = scmp.lt.s32.totalorder %s332_s30, %s332_s30 }
  0x60   :  { %383 = vmatprep.subr.bf16.mxu0 %v602_v0  ;;  %403 = vmatprep.subr.bf16.mxu1 %v602_v0  ;;  %v86_v11 = vld [vmem:[#allocation2] sm:$0xff]  ;;  %v444_v15 = vld [vmem:[#allocation8 + $0x18] sm:$0xff]   ;;  %v445_v16 = vld [vmem:[#allocation8 + $0x20] sm:$0xff]   ;;  %p564_p12 = scmp.ne.s32.totalorder %s332_s30, %s563_s6  ;;  %p569_p0 = scmp.lt.s32.totalorder %s563_s6, %s563_s6 }
  0x61   :  { %v88_v13 = vpack.c.bf16 %v87_v12, %v86_v11  ;;  %v443_v14 = vld [vmem:[#allocation8 + $0x10] sm:$0xff]   ;;  %v446_v17 = vld [vmem:[#allocation8 + $0x28] sm:$0xff]   ;;  %v448_v19 = vld [vmem:[#allocation8 + $0x38] sm:$0xff]  }
  0x62   :  { %v447_v18 = vld [vmem:[#allocation8 + $0x30] sm:$0xff]   ;;  %v345_v20 = vld [vmem:[#allocation7] ss:$0 sm:$0xff]  ;;  %v354_v38 = vld [vmem:[#allocation10] ss:$0 sm:$0xff]  ;;  %p570_p1 = por %p569_p0, %p568_p13 }
  0x63   :  { %384 = vmatpush3.bf16.msra.mxu0 %v434_v2  ;;  %404 = vmatpush3.bf16.msra.mxu1 %v442_v6 }
  0x64   :  { %385 = vmatprep.subr.bf16.mxu0 %v602_v0  ;;  %405 = vmatprep.subr.bf16.mxu1 %v602_v0  ;;  %p571_p2 = pnand %p570_p1, %p564_p12 }
  0x67   :  { %386 = vmatpush3.bf16.msra.mxu0 %v435_v3  ;;  %406 = vmatpush3.bf16.msra.mxu1 %v443_v14 }
  0x68   :  { %387 = vmatprep.subr.bf16.mxu0 %v602_v0  ;;  %407 = vmatprep.subr.bf16.mxu1 %v602_v0 }
  0x6b   :  { %388 = vmatpush3.bf16.msra.mxu0 %v436_v5  ;;  %408 = vmatpush3.bf16.msra.mxu1 %v444_v15 }
  0x6c   :  { %389 = vmatprep.subr.bf16.mxu0 %v602_v0  ;;  %409 = vmatprep.subr.bf16.mxu1 %v602_v0 }
  0x6f   :  { %390 = vmatpush3.bf16.msra.mxu0 %v437_v7  ;;  %410 = vmatpush3.bf16.msra.mxu1 %v445_v16 }
  0x70   :  { %391 = vmatprep.subr.bf16.mxu0 %v602_v0  ;;  %411 = vmatprep.subr.bf16.mxu1 %v602_v0 }
  0x73   :  { %392 = vmatpush3.bf16.msra.mxu0 %v438_v8  ;;  %412 = vmatpush3.bf16.msra.mxu1 %v446_v17 }
  0x74   :  { %393 = vmatprep.subr.bf16.mxu0 %v602_v0  ;;  %413 = vmatprep.subr.bf16.mxu1 %v602_v0 }
  0x77   :  { %394 = vmatpush3.bf16.msra.mxu0 %v439_v9  ;;  %414 = vmatpush3.bf16.msra.mxu1 %v447_v18 }
  0x78   :  { %395 = vmatprep.subr.bf16.mxu0 %v602_v0  ;;  %415 = vmatprep.subr.bf16.mxu1 %v602_v0 }
  0x7b   :  { %396 = vmatpush3.bf16.msra.mxu0 %v440_v10  ;;  %416 = vmatpush3.bf16.msra.mxu1 %v448_v19 }
  0x7e   :  { %398 = vmatmul.mubr.bf16.vlgmr.msra.gmra.mrb[0].mxu0 %v88_v13 }
 0x151   :  { %v194_v21 = vpop.f32.mrb[0].mxu0 }
 0x152   :  { %v195_v22 = vadd.f32 %v345_v20, %v194_v21  ;;  %v399_v23 = vpop.f32.mrb[1].mxu0 }
 0x153   :  { %v197_v24 = vpop.f32.mrb[2].mxu0 }
 0x154   :  { %v203_v25 = vmul.f32 0.70710677, %v195_v22  ;;  %v198_v26 = vadd.f32 %v345_v20, %v197_v24  ;;  %v400_v27 = vpop.f32.mrb[3].mxu0  ;;  %v201_v32 = vmul.f32 0.5, %v195_v22 }
 0x156   :  { %449 = verf.f32 %v203_v25  ;;  %v204_v28 = vmul.f32 0.70710677, %v198_v26  ;;  %v202_v33 = vmul.f32 0.5, %v198_v26 }
 0x158   :  { %451 = verf.f32 %v204_v28 }
 0x160   :  { %v450_v29 = vpop.eup %449 }
 0x161   :  { %v207_v30 = vadd.f32 1.0, %v450_v29 }
 0x162   :  { %v452_v31 = vpop.eup %451 }
 0x163   :  { %v208_v34 = vadd.f32 1.0, %v452_v31  ;;  %v209_v35 = vmul.f32 %v207_v30, %v201_v32 }
 0x165   :  { %v210_v36 = vmul.f32 %v208_v34, %v202_v33 }
 0x167   :  { %v211_v37 = vpack.c.bf16 %v210_v36, %v209_v35 }
 0x169   :  { %418 = vmatmul.mubr.bf16.vlgmr.msra.gmra.mrb[0].mxu1 %v211_v37 }
 0x23c   :  { %v317_v39 = vpop.f32.mrb[0].mxu1 }
 0x23d   :  { %v318_v40 = vadd.f32 %v354_v38, %v317_v39  ;;  %v419_v41 = vpop.f32.mrb[1].mxu1 }
 0x23e   :  { %v320_v42 = vpop.f32.mrb[2].mxu1 }
 0x23f   :  { %324 = vst [vmem:[#allocation11] sm:$0xff] %v318_v40  ;;  %v321_v43 = vadd.f32 %v354_v38, %v320_v42  ;;  %v420_v44 = vpop.f32.mrb[3].mxu1 }
 0x241   :  { %325 = vst [vmem:[#allocation11 + $0x8] sm:$0xff] %v321_v43 }
 0x242   :  { %574 = shalt.err (!%p571_p2)
}
 0x243   :  { %s575_s9 = scalar_lea.hbm %s718_s5, 256 }
 0x244   :  { %p576_p3 = scmp.ne.s32.totalorder %s718_s5, %s575_s9  ;;  %p579_p4 = scmp.lt.u32.totalorder %s575_s9, %s718_s5 }
 0x246   :  { %p581_p5 = pnand %p579_p4, %p576_p3 }
 0x248   :  { %584 = shalt.err (!%p581_p5)
}
 0x249   :  { %337 = dma.vmem_to_hbm [thread:$0]  %s332_s30, 256, %s718_s5, [#allocation4], %s598_s3, %s598_s3, %s599_s28  }
 0x24a   :  { %591 = dma.done.wait [#allocation4], 256  }
 0x24b   :  { %592 = vsyncadd [#allocation4], 4294967040 }
 0x24c   :  { %341 = vsyncpa [#allocation3], 1 }
 0x24d   :  { %342 = vsyncpa [#allocation6], 1 }
 0x24e   :  { %343 = vsyncpa [#allocation9], 1 }
 0x24f   :  { %344 = vsyncpa [#allocation4], 1 }

</bundles_post_ra>
